<compile_context>
chip_gen: v7x
topology: tpu7x:2x2x1
jax: 0.10.0
libtpu: 0.0.40
codegen_flags: <defaults>
</compile_context>

<pallas_src>
import math

import jax
import jax.numpy as jnp
from jax.experimental import pallas as pl
from jax.experimental.pallas import tpu as pltpu

_LANE = 128                    # lane-dense slab width (full vreg lane row -> unmasked vst)
_TARGET_BLOCK_BYTES = 4 << 20  # ~4 MiB per image block (per buffer)


def exposure_kernel(idx_ref, a_ref, b_ref, img_ref, out_ref):
    # idx_ref : SMEM int32[1]            camera index
    # a_ref   : SMEM f32[num_camera]     exposure_a (flattened)
    # b_ref   : SMEM f32[num_camera]     exposure_b (flattened)
    # img_ref : VMEM [tile_rows, _LANE]  image tile, native dtype
    # out_ref : VMEM [tile_rows, _LANE]  output tile, native dtype
    cam = idx_ref[0]
    a = a_ref[cam]                       # scalar gather from SMEM
    b = b_ref[cam]
    # exp() runs on the EUP via a 1x1 vreg splat (transcendentals are not a
    # scalar-core op); broadcasting against the tile is free VPU work.
    scale = jnp.exp(jnp.full((1, 1), a, dtype=jnp.float32))
    x = img_ref[...].astype(jnp.float32)
    y = jnp.clip(scale * x + b, 0.0, 1.0)
    out_ref[...] = y.astype(out_ref.dtype)


def _round_up(x, m):
    return -(-x // m) * m


def _vmem_limit_bytes():
    """Explicit scoped-VMEM limit, sized per chip generation."""
    try:
        cap = pltpu.get_tpu_info().vmem_capacity_bytes
    except Exception:
        cap = 64 << 20  # conservative fallback (treat like v7x)
    return (48 << 20) if cap <= (64 << 20) else (64 << 20)


def _pick_tile_rows(rows, itemsize):
    """Rows per block: ~4 MiB cap, but always >= 4 blocks for mid/large images."""
    max_tile_rows = max(8, (_TARGET_BLOCK_BYTES // (_LANE * itemsize)) // 8 * 8)
    if rows < 64:
        # Tiny image: a single block equal to the full array (exempt from the
        # (8,128) divisibility rule).
        return rows
    # Aim for >= 4 blocks (v7x two-TC sharding + pipeline depth), capped by VMEM.
    return min(max_tile_rows, _round_up(pl.cdiv(rows, 4), 8))


def exposure_forward(exposure_a, exposure_b, idx, image):
    """exposure_a/exposure_b: f32[num_camera, 1]; idx: scalar int; image: [C, H, W]."""
    num_camera = exposure_a.shape[0]
    if num_camera == 1:
        # Matches the PyTorch early-return path.
        return image

    orig_shape = image.shape
    dtype = image.dtype
    total = math.prod(orig_shape)
    itemsize = jnp.dtype(dtype).itemsize

    rows = pl.cdiv(total, _LANE)
    lane_pad = rows * _LANE - total

    flat = image.reshape((-1,))
    if lane_pad:
        # Rare path: element count not a multiple of 128.
        flat = jnp.pad(flat, (0, lane_pad))
    slab = flat.reshape((rows, _LANE))

    tile_rows = _pick_tile_rows(rows, itemsize)
    grid = (pl.cdiv(rows, tile_rows),)

    idx_arr = jnp.asarray(idx, dtype=jnp.int32).reshape((1,))
    a_flat = exposure_a.reshape((-1,)).astype(jnp.float32)
    b_flat = exposure_b.reshape((-1,)).astype(jnp.float32)

    out2d = pl.pallas_call(
        exposure_kernel,
        out_shape=jax.ShapeDtypeStruct((rows, _LANE), dtype),
        grid_spec=pltpu.PrefetchScalarGridSpec(
            num_scalar_prefetch=0,
            grid=grid,
            in_specs=[
                pl.BlockSpec(memory_space=pltpu.MemorySpace.SMEM),   # idx
                pl.BlockSpec(memory_space=pltpu.MemorySpace.SMEM),   # exposure_a
                pl.BlockSpec(memory_space=pltpu.MemorySpace.SMEM),   # exposure_b
                pl.BlockSpec((tile_rows, _LANE), lambda i: (i, 0)),  # image rows
            ],
            out_specs=pl.BlockSpec((tile_rows, _LANE), lambda i: (i, 0)),
        ),
        compiler_params=pltpu.CompilerParams(
            dimension_semantics=("parallel",),
            vmem_limit_bytes=_vmem_limit_bytes(),
        ),
    )(idx_arr, a_flat, b_flat, slab)

    out = out2d.reshape((-1,))
    if lane_pad:
        out = out[:total]
    return out.reshape(orig_shape)


def exposure_reference(exposure_a, exposure_b, idx, image):
    """Pure-JAX reference mirroring the PyTorch forward (f32 math)."""
    if exposure_a.shape[0] == 1:
        return image
    a = exposure_a[idx].astype(jnp.float32)   # shape (1,)
    b = exposure_b[idx].astype(jnp.float32)   # shape (1,)
    return jnp.clip(jnp.exp(a) * image.astype(jnp.float32) + b, 0.0, 1.0)


if __name__ == "__main__":
    key = jax.random.PRNGKey(0)
    k_a, k_b, k1, k2, k3, k4 = jax.random.split(key, 6)

    num_camera = 4
    exposure_a = 0.1 * jax.random.normal(k_a, (num_camera, 1), dtype=jnp.float32)
    exposure_b = 0.05 * jax.random.normal(k_b, (num_camera, 1), dtype=jnp.float32)

    # 1) Small f32 image: single-block path.
    image = jax.random.uniform(k1, (4, 16, 16), dtype=jnp.float32)
    out = jax.block_until_ready(exposure_forward(exposure_a, exposure_b, 2, image))
    ref = exposure_reference(exposure_a, exposure_b, 2, image)
    assert out.shape == image.shape and out.dtype == image.dtype
    assert jnp.allclose(out, ref, atol=1e-6, rtol=1e-6), "mismatch vs reference (small)"

    # 2) Moderate f32 image: multi-block (cdiv) grid with a partial final block,
    #    no row padding and no output slice.
    image2 = jax.random.uniform(k2, (3, 640, 480), dtype=jnp.float32)
    out2 = jax.block_until_ready(exposure_forward(exposure_a, exposure_b, 1, image2))
    ref2 = exposure_reference(exposure_a, exposure_b, 1, image2)
    assert out2.shape == image2.shape
    assert jnp.allclose(out2, ref2, atol=1e-6, rtol=1e-6), "mismatch vs reference (tiled)"

    # 3) Element count not a multiple of 128: lane-pad + tail-slice path.
    image3 = jax.random.uniform(k3, (3, 5, 7), dtype=jnp.float32)
    out3 = jax.block_until_ready(exposure_forward(exposure_a, exposure_b, 3, image3))
    ref3 = exposure_reference(exposure_a, exposure_b, 3, image3)
    assert out3.shape == image3.shape
    assert jnp.allclose(out3, ref3, atol=1e-6, rtol=1e-6), "mismatch vs reference (padded)"

    # 4) bf16 image: native-dtype load/store, f32 compute inside the kernel.
    image4 = jax.random.uniform(k4, (2, 64, 64), dtype=jnp.float32).astype(jnp.bfloat16)
    out4 = jax.block_until_ready(exposure_forward(exposure_a, exposure_b, 0, image4))
    ref4 = exposure_reference(exposure_a, exposure_b, 0, image4)
    assert out4.shape == image4.shape and out4.dtype == image4.dtype
    assert jnp.allclose(out4.astype(jnp.float32), ref4, atol=2e-2), "mismatch vs reference (bf16)"

    # 5) num_camera == 1 early-return path.
    out1 = exposure_forward(jnp.zeros((1, 1), jnp.float32),
                            jnp.zeros((1, 1), jnp.float32), 0, image)
    assert jnp.array_equal(out1, image)

    print("KERNEL_OK")
</pallas_src>

<mosaic_0001>
module attributes {stable_mosaic.version = 11 : i64} {
  func.func @exposure_kernel(%arg0: i32, %arg1: memref<1xi32, #tpu.memory_space<smem>>, %arg2: memref<4xf32, #tpu.memory_space<smem>>, %arg3: memref<4xf32, #tpu.memory_space<smem>>, %arg4: memref<8x128xf32, #tpu.memory_space<vmem>>, %arg5: memref<8x128xf32, #tpu.memory_space<vmem>>) attributes {dimension_semantics = [#tpu.dimension_semantics<parallel>], iteration_bounds = array<i64: 1>, scalar_prefetch = 0 : i64, scratch_operands = 0 : i64, tpu.core_type = #tpu.core_type<tc>, window_params = [{transform_indices = @transform_0, window_bounds = array<i64: 1>}, {transform_indices = @transform_1, window_bounds = array<i64: 4>}, {transform_indices = @transform_2, window_bounds = array<i64: 4>}, {transform_indices = @transform_3, window_bounds = array<i64: 8, 128>}, {transform_indices = @transform_4, window_bounds = array<i64: 8, 128>}]} {
    %c0 = arith.constant 0 : index
    %0 = memref.load %arg1[%c0] : memref<1xi32, #tpu.memory_space<smem>>
    %1 = arith.index_cast %0 : i32 to index
    %2 = memref.load %arg2[%1] : memref<4xf32, #tpu.memory_space<smem>>
    %3 = arith.index_cast %0 : i32 to index
    %4 = memref.load %arg3[%3] : memref<4xf32, #tpu.memory_space<smem>>
    %5 = vector.broadcast %2 : f32 to vector<1x1xf32>
    %6 = math.exp %5 : vector<1x1xf32>
    %c0_0 = arith.constant 0 : index
    %c0_1 = arith.constant 0 : index
    %7 = vector.load %arg4[%c0_0, %c0_1] : memref<8x128xf32, #tpu.memory_space<vmem>>, vector<8x128xf32>
    %8 = vector.broadcast %6 : vector<1x1xf32> to vector<8x128xf32>
    %9 = arith.mulf %8, %7 : vector<8x128xf32>
    %10 = vector.broadcast %4 : f32 to vector<8x128xf32>
    %11 = arith.addf %9, %10 : vector<8x128xf32>
    %cst = arith.constant 0.000000e+00 : f32
    %cst_2 = arith.constant 1.000000e+00 : f32
    %12 = vector.broadcast %cst : f32 to vector<8x128xf32>
    %13 = arith.maximumf %12, %11 : vector<8x128xf32>
    %14 = vector.broadcast %cst_2 : f32 to vector<8x128xf32>
    %15 = arith.minimumf %14, %13 : vector<8x128xf32>
    %c0_3 = arith.constant 0 : index
    %c0_4 = arith.constant 0 : index
    %16 = vector.load %arg5[%c0_3, %c0_4] : memref<8x128xf32, #tpu.memory_space<vmem>>, vector<8x128xf32>
    tpu.vector_store %arg5[%c0_3, %c0_4], %15 {strides = array<i32>} : memref<8x128xf32, #tpu.memory_space<vmem>>, vector<8x128xf32>,
    return
  }
  func.func @transform_0(%arg0: i32) -> i32 {
    %c0_i32 = arith.constant 0 : i32
    %c0_i32_0 = arith.constant 0 : i32
    return %c0_i32 : i32
  }
  func.func @transform_1(%arg0: i32) -> i32 {
    %c0_i32 = arith.constant 0 : i32
    %c0_i32_0 = arith.constant 0 : i32
    return %c0_i32 : i32
  }
  func.func @transform_2(%arg0: i32) -> i32 {
    %c0_i32 = arith.constant 0 : i32
    %c0_i32_0 = arith.constant 0 : i32
    return %c0_i32 : i32
  }
  func.func @transform_3(%arg0: i32) -> (i32, i32) {
    %c0_i32 = arith.constant 0 : i32
    %c0_i32_0 = arith.constant 0 : i32
    return %arg0, %c0_i32 : i32, i32
  }
  func.func @transform_4(%arg0: i32) -> (i32, i32) {
    %c0_i32 = arith.constant 0 : i32
    %c0_i32_0 = arith.constant 0 : i32
    return %arg0, %c0_i32 : i32, i32
  }
}

</mosaic_0001>

<bundles_post_ra>
// kernel: tpu_custom_call.1
= control target key start
LH: loop header
LB: loop body
LE: loop exit
PB: predicated region body
PF: predicated region fallthrough
CT: control target
= control target key end

     0   :  { %10 = vsyncpa [#allocation5], 0  ;;  %s185_s0 = inlined_call_operand.<no memory space> [shape: s32[1], index: 0, kind: input, shape index: {}]   ;;  %s186_s1 = inlined_call_operand.vmem [shape: f32[4], index: 1, kind: input, shape index: {}]   ;;  %s187_s2 = inlined_call_operand.vmem [shape: f32[4], index: 2, kind: input, shape index: {}]   ;;  %s188_s3 = inlined_call_operand.vmem [shape: f32[8,128], index: 3, kind: input, shape index: {}]   ;;  %s189_s4 = inlined_call_operand.hbm [shape: f32[8,128], index: 4, kind: output, shape index: {}]  }
   0x1   :  { %11 = vsyncpa [#allocation7], 0 }
   0x2   :  { %12 = vsyncpa [#allocation4], 0  ;;  %s21_s17 = sshll.u32 %s186_s1, 4  ;;  %s31_s20 = sshll.u32 %s187_s2, 4  ;;  %s22_s17 = int_to_ptr.vmem [resolvable:$true] %s21_s17  ;;  %s32_s20 = int_to_ptr.vmem [resolvable:$true] %s31_s20 }
   0x3   :  { %s78_s21 = scalar_lea.vmem %s22_s17, 16  ;;  %p83_p1 = scmp.lt.s32.totalorder %s22_s17, %s22_s17 }
   0x4   :  { %p79_p0 = scmp.ne.s32.totalorder %s22_s17, %s78_s21  ;;  %p84_p2 = scmp.lt.s32.totalorder %s78_s21, %s78_s21 }
   0x6   :  { %p85_p3 = por %p84_p2, %p83_p1 }
   0x8   :  { %p86_p4 = pnand %p85_p3, %p79_p0 }
   0xa   :  { %89 = shalt.err (!%p86_p4)
}
   0xb   :  { %s130_s22 = smov [#allocation3]   ;;  %s90_s23 = scalar_lea.vmem %s32_s20, 16 }
   0xc   :  { %24 = dma.vmem_to_smem %s22_s17, 16, %s130_s22, [#allocation5]  }
   0xd   :  { %p91_p5 = scmp.ne.s32.totalorder %s32_s20, %s90_s23  ;;  %p95_p6 = scmp.lt.s32.totalorder %s32_s20, %s32_s20 }
   0xe   :  { %p96_p7 = scmp.lt.s32.totalorder %s90_s23, %s90_s23 }
  0x10   :  { %p97_p8 = por %p96_p7, %p95_p6 }
  0x12   :  { %p98_p9 = pnand %p97_p8, %p91_p5 }
  0x14   :  { %101 = shalt.err (!%p98_p9)
}
  0x15   :  { %s131_s1 = smov [#allocation6]  }
  0x16   :  { %34 = dma.vmem_to_smem %s32_s20, 16, %s131_s1, [#allocation7]  }
  0x17   :  { %124 = dma.done.wait [#allocation5], 16  }
  0x18   :  { %125 = vsyncadd [#allocation5], 4294967280 }
  0x19   :  { %126 = dma.done.wait [#allocation7], 16  }
  0x1a   :  { %127 = vsyncadd [#allocation7], 4294967280 }
  0x1b   :  { %43 = sfence }
  0x1c   :  { %s45_s25 = sld [smem:[#allocation3 + %s185_s0]]  ;;  %v50_v2 = vld [vmem:[%s188_s3] sm:$0xff]  ;;  %s132_s5 = smov [#allocation8]  }
  0x1d   :  { %s46_s28 = sld [smem:[#allocation6 + %s185_s0]]  ;;  %s63_s6 = sshll.u32 %s132_s5, 4  ;;  %s64_s6 = int_to_ptr.vmem [resolvable:$true] %s63_s6 }
  0x1e   :  { %s102_s7 = scalar_lea.vmem %s64_s6, 128  ;;  %p107_p11 = scmp.lt.s32.totalorder %s64_s6, %s64_s6 }
  0x1f   :  { %p103_p10 = scmp.ne.s32.totalorder %s64_s6, %s102_s7  ;;  %p108_p12 = scmp.lt.s32.totalorder %s102_s7, %s102_s7 }
  0x21   :  { %p109_p13 = por %p108_p12, %p107_p11 }
  0x22   :  { %v47_v0 = vstv %s45_s25 }
  0x23   :  { %v48_v1 = vmul.f32 1.442695, %v47_v0  ;;  %v52_v4 = vstv %s46_s28  ;;  %p110_p0 = pnand %p109_p13, %p103_p10 }
  0x25   :  { %76 = vpow2.f32 %v48_v1 }
  0x2f   :  { %v77_v3 = vpop.eup %76 }
  0x30   :  { %v51_v5 = vmul.f32 %v77_v3, %v50_v2 }
  0x32   :  { %v53_v6 = vadd.f32 %v52_v4, %v51_v5 }
  0x34   :  { %v54_v7 = vmax.f32 %v53_v6, 0.0 }
  0x36   :  { %v55_v8 = vmin.f32 %v54_v7, 1.0 }
  0x38   :  { %56 = vst [vmem:[#allocation8] sm:$0xff] %v55_v8 }
  0x39   :  { %113 = shalt.err (!%p110_p0)
}
  0x3a   :  { %s114_s3 = scalar_lea.hbm %s189_s4, 128 }
  0x3b   :  { %p115_p1 = scmp.ne.s32.totalorder %s189_s4, %s114_s3  ;;  %p118_p2 = scmp.lt.u32.totalorder %s114_s3, %s189_s4 }
  0x3d   :  { %p120_p3 = pnand %p118_p2, %p115_p1 }
  0x3f   :  { %123 = shalt.err (!%p120_p3)
}
  0x40   :  { %66 = dma.vmem_to_hbm [thread:$0]  %s64_s6, 128, %s189_s4, [#allocation4]  }
  0x41   :  { %128 = dma.done.wait [#allocation4], 128  }
  0x42   :  { %129 = vsyncadd [#allocation4], 4294967168 }
  0x43   :  { %70 = vsyncpa [#allocation4], 1 }
  0x44   :  { %71 = vsyncpa [#allocation5], 1 }
  0x45   :  { %72 = vsyncpa [#allocation7], 1 }

</bundles_post_ra>
